<compile_context>
chip_gen: v7x
topology: tpu7x:2x2x1
jax: 0.10.0
libtpu: 0.0.40
codegen_flags: <defaults>
</compile_context>

<pallas_src>
import functools

import jax
import jax.numpy as jnp
from jax import lax
from jax.experimental import pallas as pl
from jax.experimental.pallas import tpu as pltpu


def _add_margin_kernel(x_ref, w_ref, inv_w_ref, labels_ref, o_ref, xn_ref,
                       *, s, m):
    j = pl.program_id(1)
    tn = o_ref.shape[1]

    # Normalize the batch tile once per i (class axis j is sequential), cache
    # it in VMEM scratch in the matmul compute dtype.  F.normalize(v, dim=1,
    # eps=1e-12) == v * min(rsqrt(sum v^2), 1e12); rsqrt runs on the EUP.
    @pl.when(j == 0)
    def _():
        x = x_ref[...].astype(jnp.float32)                               # (tb, D)
        inv_x = jnp.minimum(
            lax.rsqrt(jnp.sum(x * x, axis=-1, keepdims=True)), 1e12)     # (tb, 1)
        xn_ref[...] = (x * inv_x).astype(xn_ref.dtype)

    x_n = xn_ref[...]                     # (tb, D), weight dtype
    w = w_ref[...]                        # (tn, D), weight dtype

    # Cosine numerator on the MXU: contract over D on both operands (weight
    # tile feeds the MXU in its natural (tn, D) layout, no transpose).
    dots = lax.dot_general(
        x_n, w,
        dimension_numbers=(((1,), (1,)), ((), ())),
        preferred_element_type=jnp.float32)                              # (tb, tn)

    cosine = dots * inv_w_ref[...]        # (1, tn) f32 row of inverse norms

    # CosFace margin at the label column:
    #   out = s*cosine everywhere, s*(cosine - m) where column == label.
    col0 = j * tn
    local_lbl = labels_ref[...] - col0                                   # (tb, 1)
    col_ids = lax.broadcasted_iota(jnp.int32, cosine.shape, 1)           # (tb, tn)
    scm = s * cosine
    o_ref[...] = jnp.where(col_ids == local_lbl, scm - (s * m), scm
                           ).astype(o_ref.dtype)


def _round_up(x, mult):
    return ((x + mult - 1) // mult) * mult


def add_margin_product(inputs, weight, labels, *, s=30.0, m=0.4,
                       tb=None, tn=None, out_dtype=jnp.float32,
                       inv_w=None, weight_buffers=2, vmem_limit_bytes=None):
    """Pallas forward for AddMarginProduct (CosFace).

    inputs:  (B, in_features) float (f32 or bf16)
    weight:  (out_features, in_features) float (f32 or bf16)
    labels:  (B,) integer class ids
    inv_w:   optional precomputed (1, out_features) f32 inverse row norms of
             `weight` (e.g. from an f32 master copy when streaming bf16).
    returns: (B, out_features) in `out_dtype` (default f32).
    """
    B, D = inputs.shape
    N, D2 = weight.shape
    assert D == D2

    w_dtype = weight.dtype
    x_b = jnp.dtype(inputs.dtype).itemsize
    w_b = jnp.dtype(w_dtype).itemsize
    out_b = jnp.dtype(out_dtype).itemsize
    cmp_b = w_b  # matmul compute dtype == weight dtype

    # Per-row inverse weight norms, hoisted out of the grid and computed in
    # f32 (matches F.normalize eps handling: min(rsqrt(sumsq), 1e12)).
    if inv_w is None:
        w_f32 = weight.astype(jnp.float32)
        inv_w = jnp.minimum(
            lax.rsqrt(jnp.sum(w_f32 * w_f32, axis=1)[None, :]), 1e12)
    inv_w = inv_w.reshape(1, N).astype(jnp.float32)

    # Generation-aware VMEM budget (v5e/v6e ~128 MiB, v7x ~64 MiB per TC).
    try:
        info = pltpu.get_tpu_info()
        vmem_cap = int(getattr(info, "vmem_capacity_bytes", 0)) or (64 << 20)
    except Exception:  # pragma: no cover - conservative fallback
        vmem_cap = 64 << 20
    budget = (vmem_cap * 3) // 4  # ~25% headroom for compiler scratch

    nbuf_w = max(2, int(weight_buffers))

    def est(tb_, tn_):
        return (2 * tb_ * D * x_b              # input tiles (double-buffered)
                + tb_ * D * cmp_b              # cached normalized x scratch
                + nbuf_w * tn_ * D * w_b       # streamed weight tiles
                + 2 * 8 * tn_ * 4              # inv_w tiles (sublane padded)
                + 2 * tb_ * 128 * 4            # label tiles (lane padded)
                + 2 * tb_ * tn_ * out_b)       # output tiles

    # Default class tile: as wide as the budget allows (lane-dense).
    if tn is None:
        if N <= 1024:
            tn = N
        else:
            tn = 128
            for cand in (2048, 1024, 512, 256, 128):
                if cand <= N and est(B if tb is None else tb, cand) <= budget:
                    tn = cand
                    break
    # Default batch tile: whole batch resident so weight is read exactly once.
    if tb is None:
        tb = B
        while est(tb, tn) > budget and tb > 8:
            tb = max(8, _round_up(tb // 2, 8))

    assert tb == B or tb % 8 == 0, "tb must be a multiple of 8 or equal to B"
    assert tn == N or tn % 128 == 0, "tn must be a multiple of 128 or equal to N"

    if vmem_limit_bytes is None:
        vmem_limit_bytes = int(min(vmem_cap,
                                   max(est(tb, tn) + (est(tb, tn) // 2),
                                       32 * 1024 * 1024)))

    labels_2d = labels.astype(jnp.int32).reshape(B, 1)
    grid = (pl.cdiv(B, tb), pl.cdiv(N, tn))

    if nbuf_w > 2:
        w_spec = pl.BlockSpec((tn, D), lambda i, j: (j, 0),
                              pipeline_mode=pl.Buffered(nbuf_w))
    else:
        w_spec = pl.BlockSpec((tn, D), lambda i, j: (j, 0))

    kernel = functools.partial(_add_margin_kernel, s=float(s), m=float(m))

    return pl.pallas_call(
        kernel,
        out_shape=jax.ShapeDtypeStruct((B, N), out_dtype),
        grid_spec=pltpu.PrefetchScalarGridSpec(
            num_scalar_prefetch=0,
            grid=grid,
            in_specs=[
                pl.BlockSpec((tb, D), lambda i, j: (i, 0)),   # inputs (per i)
                w_spec,                                       # weight (streamed over j)
                pl.BlockSpec((1, tn), lambda i, j: (0, j)),   # inv weight norms
                pl.BlockSpec((tb, 1), lambda i, j: (i, 0)),   # labels
            ],
            out_specs=pl.BlockSpec((tb, tn), lambda i, j: (i, j)),
            scratch_shapes=[pltpu.VMEM((tb, D), w_dtype)],    # cached x_n
        ),
        compiler_params=pltpu.CompilerParams(
            # j must stay sequential per core so the x_n cache is valid.
            dimension_semantics=("parallel", "arbitrary"),
            vmem_limit_bytes=vmem_limit_bytes,
        ),
    )(inputs, weight, inv_w, labels_2d)


def _reference(inputs, weight, labels, s=30.0, m=0.4):
    x_n = inputs / jnp.maximum(
        jnp.linalg.norm(inputs, axis=1, keepdims=True), 1e-12)
    w_n = weight / jnp.maximum(
        jnp.linalg.norm(weight, axis=1, keepdims=True), 1e-12)
    cosine = (x_n @ w_n.T).astype(jnp.float32)
    one_hot = jax.nn.one_hot(labels, weight.shape[0], dtype=jnp.float32)
    return s * (one_hot * (cosine - m) + (1.0 - one_hot) * cosine)


if __name__ == "__main__":
    # Small shapes that still exercise the (B, N) grid when explicit tiles are
    # given: tb=8, tn=256 -> grid = (2, 2).
    B, IN_FEATURES, OUT_FEATURES = 16, 128, 512
    s_param, m_param = 30.0, 0.4

    key = jax.random.PRNGKey(0)
    kx, kw, kl = jax.random.split(key, 3)

    # Deterministic xavier_uniform_-style init (out_features, in_features).
    bound = (6.0 / (IN_FEATURES + OUT_FEATURES)) ** 0.5
    weight = jax.random.uniform(
        kw, (OUT_FEATURES, IN_FEATURES), dtype=jnp.float32,
        minval=-bound, maxval=bound)

    inputs = jax.random.normal(kx, (B, IN_FEATURES), dtype=jnp.float32)
    labels = jax.random.randint(kl, (B,), 0, OUT_FEATURES, dtype=jnp.int32)

    ref = _reference(inputs, weight, labels, s=s_param, m=m_param)

    # 1) f32 path with explicit small tiles (exercises the 2x2 grid and the
    #    per-i x_n cache refill): must match the PyTorch-equivalent reference.
    out = add_margin_product(inputs, weight, labels,
                             s=s_param, m=m_param, tb=8, tn=256)
    out = jax.block_until_ready(out)
    assert out.shape == (B, OUT_FEATURES)
    err = float(jnp.max(jnp.abs(out - ref)))
    assert err < 1e-3, err

    # 2) Default tiles (whole batch resident, full-N class tile -> weight read
    #    exactly once): still tight vs the reference.
    out_d = add_margin_product(inputs, weight, labels, s=s_param, m=m_param)
    out_d = jax.block_until_ready(out_d)
    err_d = float(jnp.max(jnp.abs(out_d - ref)))
    assert err_d < 1e-3, err_d

    # 3) bf16 weight streaming + bf16 logits (half read + half write traffic);
    #    inv_w is computed in f32 from the f32 master weight.  Looser tol
    #    since the reference uses f32 weights end-to-end.
    inv_w_master = jnp.minimum(
        lax.rsqrt(jnp.sum(weight * weight, axis=1)[None, :]), 1e12)
    out_bf16 = add_margin_product(
        inputs, weight.astype(jnp.bfloat16), labels,
        s=s_param, m=m_param, out_dtype=jnp.bfloat16, inv_w=inv_w_master)
    out_bf16 = jax.block_until_ready(out_bf16)
    err_bf16 = float(jnp.max(jnp.abs(out_bf16.astype(jnp.float32) - ref)))
    assert err_bf16 < 0.5, err_bf16

    print("KERNEL_OK")
</pallas_src>

<mosaic_0001>
module attributes {stable_mosaic.version = 11 : i64} {
  func.func @_add_margin_kernel(%arg0: i32, %arg1: i32, %arg2: memref<8x128xf32, #tpu.memory_space<vmem>>, %arg3: memref<256x128xf32, #tpu.memory_space<vmem>>, %arg4: memref<1x256xf32, #tpu.memory_space<vmem>>, %arg5: memref<8x1xi32, #tpu.memory_space<vmem>>, %arg6: memref<8x256xf32, #tpu.memory_space<vmem>>, %arg7: memref<8x128xf32, #tpu.memory_space<vmem>>) attributes {dimension_semantics = [#tpu.dimension_semantics<parallel>, #tpu.dimension_semantics<arbitrary>], iteration_bounds = array<i64: 2, 2>, scalar_prefetch = 0 : i64, scratch_operands = 1 : i64, tpu.core_type = #tpu.core_type<tc>, window_params = [{transform_indices = @transform_0, window_bounds = array<i64: 8, 128>}, {transform_indices = @transform_1, window_bounds = array<i64: 256, 128>}, {transform_indices = @transform_2, window_bounds = array<i64: 1, 256>}, {transform_indices = @transform_3, window_bounds = array<i64: 8, 1>}, {transform_indices = @transform_4, window_bounds = array<i64: 8, 256>}]} {
    %c0_i32 = arith.constant 0 : i32
    %0 = arith.cmpi eq, %arg1, %c0_i32 : i32
    %1 = arith.extui %0 : i1 to i32
    %c0_i32_0 = arith.constant 0 : i32
    %2 = arith.cmpi ne, %1, %c0_i32_0 : i32
    scf.if %2 {
      %c0_12 = arith.constant 0 : index
      %c0_13 = arith.constant 0 : index
      %22 = vector.load %arg2[%c0_12, %c0_13] : memref<8x128xf32, #tpu.memory_space<vmem>>, vector<8x128xf32>
      %23 = arith.mulf %22, %22 : vector<8x128xf32>
      %cst_14 = arith.constant dense<0.000000e+00> : vector<8xf32>
      %24 = vector.multi_reduction <add>, %23, %cst_14 [1] : vector<8x128xf32> to vector<8xf32>
      %25 = vector.shape_cast %24 : vector<8xf32> to vector<8x1xf32>
      %26 = math.rsqrt %25 : vector<8x1xf32>
      %cst_15 = arith.constant 9.99999995E+11 : f32
      %27 = vector.broadcast %cst_15 : f32 to vector<8x1xf32>
      %28 = arith.minimumf %26, %27 : vector<8x1xf32>
      %29 = vector.broadcast %28 : vector<8x1xf32> to vector<8x128xf32>
      %30 = arith.mulf %22, %29 : vector<8x128xf32>
      %c0_16 = arith.constant 0 : index
      %c0_17 = arith.constant 0 : index
      %31 = vector.load %arg7[%c0_16, %c0_17] : memref<8x128xf32, #tpu.memory_space<vmem>>, vector<8x128xf32>
      tpu.vector_store %arg7[%c0_16, %c0_17], %30 {strides = array<i32>} : memref<8x128xf32, #tpu.memory_space<vmem>>, vector<8x128xf32>,
    } else {
    }
    %c0 = arith.constant 0 : index
    %c0_1 = arith.constant 0 : index
    %3 = vector.load %arg7[%c0, %c0_1] : memref<8x128xf32, #tpu.memory_space<vmem>>, vector<8x128xf32>
    %c0_2 = arith.constant 0 : index
    %c0_3 = arith.constant 0 : index
    %4 = vector.load %arg3[%c0_2, %c0_3] : memref<256x128xf32, #tpu.memory_space<vmem>>, vector<256x128xf32>
    %cst = arith.constant dense<0.000000e+00> : vector<8x256xf32>
    %5 = tpu.matmul %3, %4, %cst {dimension_numbers = #tpu.dot_dimension_numbers<[1], [1], [0], [0], [0, 0, 1, 0], [], []>} : vector<8x128xf32>, vector<256x128xf32>, vector<8x256xf32> -> vector<8x256xf32>
    %c0_4 = arith.constant 0 : index
    %c0_5 = arith.constant 0 : index
    %6 = vector.load %arg4[%c0_4, %c0_5] : memref<1x256xf32, #tpu.memory_space<vmem>>, vector<1x256xf32>
    %7 = vector.broadcast %6 : vector<1x256xf32> to vector<8x256xf32>
    %8 = arith.mulf %5, %7 : vector<8x256xf32>
    %c256_i32 = arith.constant 256 : i32
    %9 = arith.muli %arg1, %c256_i32 : i32
    %c0_6 = arith.constant 0 : index
    %c0_7 = arith.constant 0 : index
    %10 = vector.load %arg5[%c0_6, %c0_7] : memref<8x1xi32, #tpu.memory_space<vmem>>, vector<8x1xi32>
    %11 = vector.broadcast %9 : i32 to vector<8x1xi32>
    %12 = arith.subi %10, %11 : vector<8x1xi32>
    %13 = tpu.iota {dimensions = array<i32: 1>} : vector<8x256xi32>
    %cst_8 = arith.constant 3.000000e+01 : f32
    %14 = vector.broadcast %cst_8 : f32 to vector<8x256xf32>
    %15 = arith.mulf %14, %8 : vector<8x256xf32>
    %16 = vector.broadcast %12 : vector<8x1xi32> to vector<8x256xi32>
    %17 = arith.cmpi eq, %13, %16 : vector<8x256xi32>
    %cst_9 = arith.constant 1.200000e+01 : f32
    %18 = vector.broadcast %cst_9 : f32 to vector<8x256xf32>
    %19 = arith.subf %15, %18 : vector<8x256xf32>
    %20 = arith.select %17, %19, %15 : vector<8x256xi1>, vector<8x256xf32>
    %c0_10 = arith.constant 0 : index
    %c0_11 = arith.constant 0 : index
    %21 = vector.load %arg6[%c0_10, %c0_11] : memref<8x256xf32, #tpu.memory_space<vmem>>, vector<8x256xf32>
    tpu.vector_store %arg6[%c0_10, %c0_11], %20 {strides = array<i32>} : memref<8x256xf32, #tpu.memory_space<vmem>>, vector<8x256xf32>,
    return
  }
  func.func @transform_0(%arg0: i32, %arg1: i32) -> (i32, i32) {
    %c0_i32 = arith.constant 0 : i32
    %c0_i32_0 = arith.constant 0 : i32
    return %arg0, %c0_i32 : i32, i32
  }
  func.func @transform_1(%arg0: i32, %arg1: i32) -> (i32, i32) {
    %c0_i32 = arith.constant 0 : i32
    %c0_i32_0 = arith.constant 0 : i32
    return %arg1, %c0_i32 : i32, i32
  }
  func.func @transform_2(%arg0: i32, %arg1: i32) -> (i32, i32) {
    %c0_i32 = arith.constant 0 : i32
    %c0_i32_0 = arith.constant 0 : i32
    return %c0_i32, %arg1 : i32, i32
  }
  func.func @transform_3(%arg0: i32, %arg1: i32) -> (i32, i32) {
    %c0_i32 = arith.constant 0 : i32
    %c0_i32_0 = arith.constant 0 : i32
    return %arg0, %c0_i32 : i32, i32
  }
  func.func @transform_4(%arg0: i32, %arg1: i32) -> (i32, i32) {
    %c0_i32 = arith.constant 0 : i32
    return %arg0, %arg1 : i32, i32
  }
}

</mosaic_0001>

<bundles_post_ra>
// kernel: tpu_custom_call.1
= control target key start
LH: loop header
LB: loop body
LE: loop exit
PB: predicated region body
PF: predicated region fallthrough
CT: control target
= control target key end

     0   :  { %s1242_s0 = inlined_call_operand.vmem [shape: f32[16,128], index: 0, kind: input, shape index: {}]   ;;  %s1243_s1 = inlined_call_operand.hbm [shape: f32[512,128], index: 1, kind: input, shape index: {}]   ;;  %s1244_s2 = inlined_call_operand.vmem [shape: f32[1,512], index: 2, kind: input, shape index: {}]   ;;  %s1245_s3 = inlined_call_operand.vmem [shape: s32[16,1], index: 3, kind: input, shape index: {}]   ;;  %s1246_s4 = inlined_call_operand.hbm [shape: f32[16,512], index: 4, kind: output, shape index: {}]  }
   0x1   :  { %1253 = sst [smem:[#allocation14_spill]] %s1243_s1 }
   0x2   :  { %9 = vsyncpa [#allocation4], 0 }
   0x3   :  { %11 = vsyncpa [#allocation4 + $0x1], 0 }
   0x4   :  { %12 = vsyncpa [#allocation5], 0 }
   0x5   :  { %14 = vsyncpa [#allocation5 + $0x1], 0  ;;  %s951_s15 = smov 0   ;;  %s953_s16 = smov 0  }
   0x6   :  { %s955_s17 = smov 0   ;;  %s957_s18 = smov 0  }
   0x7   :  { %s959_s19 = smov 0   ;;  %s961_s20 = smov 0  }
   0x8   :  { %s963_s21 = smov 0   ;;  %s965_s22 = smov 0  }
   0x9   :  { %s967_s23 = smov 0   ;;  %s969_s24 = smov 0  }
   0xa   :  { %s971_s25 = smov 0  }
   0xb LB: > { %1254 = sst [smem:[#allocation9_spill]] %s911_s23  ;;  %s569_s26 = sadd.s32 4294967295, %s919_s25   ;;  %s919_s25 = sphi %s971_s25, %s20_s25   ;;  %s915_s24 = sphi %s969_s24, %s1273_s24   ;;  %s911_s23 = sphi %s967_s23, %s1272_s23   ;;  %s907_s22 = sphi %s965_s22, %s1271_s22   ;;  %s903_s21 = sphi %s963_s21, %s1270_s21   ;;  %s899_s20 = sphi %s961_s20, %s1279_s20   ;;  %s895_s19 = sphi %s959_s19, %s1278_s19   ;;  %s891_s18 = sphi %s957_s18, %s1277_s18   ;;  %s887_s17 = sphi %s955_s17, %s1276_s17   ;;  %s883_s16 = sphi %s953_s16, %s1275_s16   ;;  %s879_s15 = sphi %s951_s15, %s1274_s15  }
   0xc   : > { %1255 = sst [smem:[#allocation10_spill]] %s915_s24  ;;  %s570_s27 = sadd.s32 4294967294, %s919_s25  }
   0xd   : > { %s29_s28 = sadd.s32 1, %s911_s23  ;;  %s32_s29 = sadd.s32 1, %s915_s24 }
   0xe   : > { %p30_p0 = scmp.ge.s32.totalorder %s29_s28, 2  ;;  %s65_s30 = sadd.s32 1, %s899_s20 }
   0xf   : > { %p72_p1 = scmp.ne.s32.totalorder %s899_s20, %s895_s19  ;;  %p73_p2 = scmp.eq.s32.totalorder %s919_s25, 0 }
  0x10   : > { %s1281_s28 = smov (%p30_p0, %s29_s28), 0  ;;  %s1283_s29 = smov (!%p30_p0, %s32_s29), %s915_s24 }
  0x11   : > { %1256 = sst [smem:[#allocation11_spill]] %s1281_s28  ;;  %s62_s5 = ssub.s32 %s911_s23, %s1281_s28 }
  0x12   : > { %p1017_p3 = por %p73_p2, %p72_p1  ;;  %p34_p4 = scmp.ge.s32.totalorder %s1283_s29, 2 }
  0x13   : > { %p63_p5 = scmp.eq.s32.totalorder %s62_s5, 0  ;;  %p78_p6 = scmp.ne.s32.totalorder %s895_s19, %s891_s18 }
  0x14   : > { %p79_p7 = scmp.eq.s32.totalorder %s569_s26, 0  ;;  %s1285_s29 = smov (%p34_p4, %s1283_s29), 0 }
  0x15   : > { %1258 = sst [smem:[#allocation12_spill]] %s1285_s29  ;;  %s140_s9 = ssub.s32 %s915_s24, %s1285_s29 }
  0x16   : > { %s1025_s7 = scalar_select %p63_p5, %s899_s20, %s65_s30  }
  0x17   : > { %p1027_p8 = por %p79_p7, %p78_p6  ;;  %s142_s10 = sor.u32 %s140_s9, %s62_s5 }
  0x18   : > { %1259 = sst [smem:[#allocation13_spill]] %s1025_s7  ;;  %s145_s11 = sadd.s32 1, %s887_s17 }
  0x19   : > { %p143_p9 = scmp.eq.s32.totalorder %s142_s10, 0  ;;  %p155_p10 = scmp.ne.s32.totalorder %s887_s17, %s883_s16 }
  0x1a   : > { %p156_p11 = scmp.eq.s32.totalorder %s569_s26, 3  ;;  %p161_p12 = scmp.ne.s32.totalorder %s883_s16, %s879_s15 }
  0x1b   : > { %s1039_s12 = scalar_select %p143_p9, %s887_s17, %s145_s11  }
  0x1c   : > { %p1041_p13 = por %p156_p11, %p155_p10  ;;  %p162_p0 = scmp.eq.s32.totalorder %s570_s27, 3 }
  0x1d   : > { %p671_p1 = scmp.lt.s32.totalorder %s919_s25, 4  ;;  %s189_s18 = sand.u32 1, %s899_s20  }
  0x1e   : > { %s1261_s13 = scalar_select %p1041_p13, 1, 0 }
  0x1f   : > { %p1046_p2 = por %p162_p0, %p161_p12  ;;  %s573_s30 = sshll.u32 %s189_s18, 8 }
  0x20   : > { %s592_s5 = sshll.u32 %s911_s23, 12  ;;  %s1263_s1 = sld [smem:[#allocation14_spill]] }
  0x21   : > { %s1262_s14 = scalar_select %p1046_p2, 1, 0 }
  0x22   : > { %s193_s11 = scalar_lea.vmem [#allocation3], %s573_s30  ;;  %p1061_p4 = pnand %p671_p1, %p1017_p3 }
  0x23   : > { %s200_s29 = sshll.u32 %s193_s11, 4  ;;  %s1066_s28 = scalar_lea.sflag [#allocation4], %s189_s18  ;;  %s1057_s29 = int_to_ptr.vmem [resolvable:$true] %s200_s29 }
  0x24   : > { %p769_p7 = pneg %p1061_p4 }
  0x26   : > { %s1055_s26 = scalar_lea.hbm %s1263_s1, %s592_s5  ;;  %s772_s6 = scalar_lea.hbm %s1263_s1, 8192 }
  0x27   : > { %s767_s5 = scalar_lea.hbm %s1055_s26, 4096  ;;  %p773_p3 = scmp.lt.u32.totalorder %s1055_s26, %s1263_s1 }
  0x28   : > { %p768_p6 = scmp.ne.s32.totalorder %s1055_s26, %s767_s5  ;;  %p774_p11 = scmp.lt.u32.totalorder %s772_s6, %s767_s5 }
  0x29   : > { %p776_p0 = scmp.lt.u32.totalorder %s767_s5, %s1055_s26 }
  0x2a   : > { %p770_p9 = pnand %p769_p7, %p768_p6  ;;  %p775_p12 = por %p774_p11, %p773_p3 }
  0x2c   : > { %p771_p10 = pneg %p770_p9  ;;  %p777_p1 = por %p776_p0, %p775_p12 }
  0x2e   : > { %p778_p5 = pnand %p777_p1, %p771_p10 }
  0x30   : > { %781 = shalt.err (!%p778_p5)
}
  0x31   : > { %s782_s18 = scalar_lea.vmem %s1057_s29, 4096  ;;  %s921_s30 = smov [#allocation3]  }
  0x32   : > { %p783_p6 = scmp.ne.s32.totalorder %s1057_s29, %s782_s18  ;;  %s787_s9 = sshll.u32 %s921_s30, 4  ;;  %s788_s9 = int_to_ptr.vmem [resolvable:$false] %s787_s9 }
  0x33   : > { %s789_s10 = scalar_lea.vmem %s788_s9, 8192  ;;  %p790_p13 = scmp.lt.s32.totalorder %s1057_s29, %s788_s9 }
  0x34   : > { %p785_p9 = pnand %p783_p6, %p769_p7  ;;  %p791_p3 = scmp.lt.s32.totalorder %s789_s10, %s782_s18 }
  0x36   : > { %p786_p2 = pneg %p785_p9  ;;  %p792_p11 = por %p791_p3, %p790_p13 }
  0x38   : > { %p793_p12 = pnand %p792_p11, %p786_p2 }
  0x3a   : > { %796 = shalt.err (!%p793_p12)
}
  0x3b   : > { %s922_s5 = smov 128   ;;  %s923_s6 = smov 8  }
  0x3c   : > { %666 = dma.hbm_to_vmem [thread:$0]  (!%p1061_p4), %s1055_s26, 4096, %s1057_s29, %s1066_s28, %s922_s5, %s922_s5, %s923_s6  }
  0x3d   : > { %p223_p5 = scmp.lt.s32.totalorder %s919_s25, 5  ;;  %p1265_p7 = scmp.ge.s32.totalorder %s919_s25, 1 }
  0x3f   : > { %p224_p10 = pnand %p1265_p7, %p223_p5 }
  0x40   : > { %s229_s11 = sand.u32 (!%p224_p10), 1, %s895_s19  }
  0x41   : > { %227 = sbr.rel (%p224_p10) target bundleno = 542 (0x21e), region = 36  ;;  %s577_s18 = sshll.u32 (!%p224_p10), %s229_s11, 8 }
  0x42   : > { %s230_s30 = scalar_lea.sflag (!%p224_p10), [#allocation4], %s229_s11  ;;  %s1098_s9 = scalar_lea.vmem (!%p224_p10), [#allocation3], %s577_s18 }
  0x48   : > { %870 = dma.done.wait (%p1027_p8), %s230_s30, 4096  }
  0x49   : > { %872 = vsyncadd (%p1027_p8), %s230_s30, 4294963200  ;;  %s1251_s28 = sand.u32 1, %s883_s16   ;;  %p270_p13 = scmp.lt.s32.totalorder %s907_s22, 1 }
  0x4a   : > { %s578_s29 = sshll.u32 %s1251_s28, 4  ;;  %s1109_s26 = sshll.u32 %s903_s21, 1 }
  0x4b   : > { %p276_p2 = scmp.lt.s32.totalorder %s1109_s26, 3  ;;  %s1128_s7 = scalar_lea.vmem [#allocation6], %s578_s29 }
  0x4c   : > { %s271_s27 = scalar_select %p270_p13, %s907_s22, 1 }
  0x4d   : > { %s1114_s10 = scalar_select %p276_p2, %s1109_s26, 3 }
  0x4e   : > { %s579_s8 = sshll.u32 %s271_s27, 3  ;;  %p582_p8 = scmp.ne.s32.totalorder %s903_s21, 0 }
  0x4f   : > { %s273_s11 = scalar_lea.vmem %s1242_s0, %s579_s8  ;;  %s278_s1 = scalar_lea.vmem %s1244_s2, %s1114_s10 }
  0x50   : > { %s1126_s23 = scalar_lea.vmem %s1245_s3, %s579_s8  ;;  %288 = sbr.rel (%p582_p8) target bundleno = 241 (0xf1), region = 44  ;;  %v289_v0 = vld [vmem:[%s273_s11] sm:$0xff] (!%p582_p8) }
  0x51   : > { %v290_v1 = vmul.f32 (!%p582_p8), %v289_v0, %v289_v0 }
  0x53   : > { %291 = vadd.xlane.f32.xlu0 (!%p582_p8), %v290_v1 }
  0xe0   : > { %v292_v2 = vpop.xlane.xlu0 %291 }
  0xe1   : > { %764 = vrsqrt.f32 %v292_v2 }
  0xeb   : > { %v765_v3 = vpop.eup %764 }
  0xec   : > { %v294_v4 = vmin.f32 %v765_v3, 1e+12 }
  0xee   : > { %v295_v5 = vmul.f32 %v294_v4, %v289_v0 }
  0xf0   : > { %296 = vst [vmem:[#allocation2] sm:$0xff] %v295_v5 }
  0xf1 PF: > { %v314_v6 = vld [vmem:[%s1098_s9 + $0x80] sm:$0xff]  ;;  %v315_v7 = vld [vmem:[%s1098_s9 + $0x88] sm:$0xff]  ;;  %v316_v11 = vld [vmem:[%s1098_s9 + $0x90] sm:$0xff]  ;;  %v924_v13 = vmov 0   ;;  %s583_s24 = sshll.u32 %s903_s21, 8  ;;  %v403_v59 = vlaneseq  ;;  %s588_s28 = sshll.u32 %s907_s22, 2 }
  0xf2   : > { %v298_v8 = vld [vmem:[%s1098_s9] sm:$0xff]  ;;  %v627_v9 = vpack.c.bf16 %v315_v7, %v314_v6  ;;  %v299_v10 = vld [vmem:[%s1098_s9 + $0x8] sm:$0xff]  ;;  %v317_v12 = vld [vmem:[%s1098_s9 + $0x98] sm:$0xff]  ;;  %766 = vset.pattern.permute.xlu0 %v924_v13  ;;  %v417_v22 = vstv %s583_s24  ;;  %s452_s29 = sshll.u32 %s1128_s7, 4  ;;  %p1267_p0 = scmp.ne.s32.totalorder %s1261_s13, 0  ;;  %s1178_s29 = int_to_ptr.vmem [resolvable:$true] %s452_s29 }
  0xf3   : > { %v629_v14 = vpack.c.bf16 %v299_v10, %v298_v8  ;;  %v631_v15 = vpack.c.bf16 %v317_v12, %v316_v11  ;;  %v300_v16 = vld [vmem:[%s1098_s9 + $0x10] sm:$0xff]  ;;  %v301_v17 = vld [vmem:[%s1098_s9 + $0x18] sm:$0xff]  ;;  %v318_v18 = vld [vmem:[%s1098_s9 + $0xa0] sm:$0xff]  ;;  %v404_v60 = vshrl.u32 %v403_v59, 7  ;;  %v420_v1 = vand.u32 127, %v403_v59  ;;  %s797_s5 = scalar_lea.vmem %s1178_s29, 256 }
  0xf4   : > { %628 = vmatprep.subr.bf16.mxu0 %v627_v9  ;;  %v319_v19 = vld [vmem:[%s1098_s9 + $0xa8] sm:$0xff]  ;;  %v633_v20 = vpack.c.bf16 %v301_v17, %v300_v16  ;;  %v416_v24 = vld [vmem:[%s1126_s23] sm:$0xff]  ;;  %v302_v26 = vld [vmem:[%s1098_s9 + $0x20] sm:$0xff]  ;;  %p798_p4 = scmp.ne.s32.totalorder %s1178_s29, %s797_s5  ;;  %s925_s6 = smov [#allocation6]  }
  0xf5   : > { %630 = vmatpush3.bf16.xpose.msra.mxu0 %v629_v14  ;;  %v635_v21 = vpack.c.bf16 %v319_v19, %v318_v18  ;;  %v418_v25 = vsub.s32 %v416_v24, %v417_v22  ;;  %v303_v27 = vld [vmem:[%s1098_s9 + $0x28] sm:$0xff]  ;;  %v320_v28 = vld [vmem:[%s1098_s9 + $0xb0] sm:$0xff]  ;;  %v321_v29 = vld [vmem:[%s1098_s9 + $0xb8] sm:$0xff]  ;;  %v405_v61 = vsub.s32 0, %v404_v60  ;;  %v409_v63 = vsub.s32 1, %v404_v60  ;;  %s801_s11 = sshll.u32 %s925_s6, 4  ;;  %s802_s11 = int_to_ptr.vmem [resolvable:$false] %s801_s11 }
  0xf6   : > { %632 = vmatprep.subr.bf16.mxu0 %v631_v15  ;;  %v637_v30 = vpack.c.bf16 %v303_v27, %v302_v26  ;;  %v639_v31 = vpack.c.bf16 %v321_v29, %v320_v28  ;;  %v304_v32 = vld [vmem:[%s1098_s9 + $0x30] sm:$0xff]  ;;  %v305_v33 = vld [vmem:[%s1098_s9 + $0x38] sm:$0xff]  ;;  %v322_v34 = vld [vmem:[%s1098_s9 + $0xc0] sm:$0xff]  ;;  %v421_v7 = vadd.s32 128, %v420_v1  ;;  %p799_p1 = pnand %p798_p4, %p1267_p0  ;;  %s803_s18 = scalar_lea.vmem %s802_s11, 512 }
  0xf7   : > { %v297_v23 = vld [vmem:[#allocation2] sm:$0xff]  ;;  %425 = vperm.xlu0 %766, %v418_v25   ;;  %v323_v35 = vld [vmem:[%s1098_s9 + $0xc8] sm:$0xff]  ;;  %v641_v36 = vpack.c.bf16 %v305_v33, %v304_v32  ;;  %v306_v38 = vld [vmem:[%s1098_s9 + $0x40] sm:$0xff]  ;;  %p804_p9 = scmp.lt.s32.totalorder %s1178_s29, %s802_s11  ;;  %p805_p3 = scmp.lt.s32.totalorder %s803_s18, %s797_s5 }
  0xf8   : > { %625 = vmatprep.mubr.f32.mxu0 %v297_v23  ;;  %v643_v37 = vpack.c.bf16 %v323_v35, %v322_v34  ;;  %v307_v39 = vld [vmem:[%s1098_s9 + $0x48] sm:$0xff]  ;;  %v324_v40 = vld [vmem:[%s1098_s9 + $0xd0] sm:$0xff]  ;;  %v325_v41 = vld [vmem:[%s1098_s9 + $0xd8] sm:$0xff]  ;;  %p800_p6 = pneg %p799_p1 }
  0xf9   : > { %v645_v42 = vpack.c.bf16 %v307_v39, %v306_v38  ;;  %v647_v43 = vpack.c.bf16 %v325_v41, %v324_v40  ;;  %v308_v44 = vld [vmem:[%s1098_s9 + $0x50] sm:$0xff]  ;;  %v309_v45 = vld [vmem:[%s1098_s9 + $0x58] sm:$0xff]  ;;  %v326_v46 = vld [vmem:[%s1098_s9 + $0xe0] sm:$0xff]  ;;  %p806_p11 = por %p805_p3, %p804_p9 }
  0xfa   : > { %v327_v47 = vld [vmem:[%s1098_s9 + $0xe8] sm:$0xff]  ;;  %v649_v48 = vpack.c.bf16 %v309_v45, %v308_v44  ;;  %v310_v50 = vld [vmem:[%s1098_s9 + $0x60] sm:$0xff]  ;;  %v328_v52 = vld [vmem:[%s1098_s9 + $0xf0] sm:$0xff] }
  0xfb   : > { %v651_v49 = vpack.c.bf16 %v327_v47, %v326_v46  ;;  %v311_v51 = vld [vmem:[%s1098_s9 + $0x68] sm:$0xff]  ;;  %v329_v53 = vld [vmem:[%s1098_s9 + $0xf8] sm:$0xff]  ;;  %v312_v56 = vld [vmem:[%s1098_s9 + $0x70] sm:$0xff]  ;;  %p807_p12 = pnand %p806_p11, %p800_p6 }
  0xfc   : > { %v653_v54 = vpack.c.bf16 %v311_v51, %v310_v50  ;;  %v655_v55 = vpack.c.bf16 %v329_v53, %v328_v52  ;;  %v313_v57 = vld [vmem:[%s1098_s9 + $0x78] sm:$0xff]  ;;  %s448_s9 = sadd.s32 %s588_s28, %s1109_s26  ;;  %s1266_s26 = sand.u32 1, %s883_s16  }
  0xfd   : > { %634 = vmatpush3.bf16.xpose.msra.mxu0 %v633_v20  ;;  %v657_v58 = vpack.c.bf16 %v313_v57, %v312_v56  ;;  %v401_v62 = vld [vmem:[%s278_s1] sm:$0x3]  ;;  %s589_s1 = sshll.u32 %s448_s9, 7  ;;  %s436_s8 = scalar_lea.sflag [#allocation5], %s1266_s26 }
  0xfe   : > { %636 = vmatprep.subr.bf16.mxu0 %v635_v21  ;;  %v406_v0 = vrot.slane %v401_v62, %v405_v61  ;;  %v410_v2 = vrot.slane %v401_v62, %v409_v63  ;;  %s1176_s10 = scalar_lea.hbm %s1246_s4, %s589_s1 }
 0x105   : > { %638 = vmatpush3.bf16.xpose.msra.mxu0 %v637_v30 }
 0x106   : > { %640 = vmatprep.subr.bf16.mxu0 %v639_v31 }
 0x10d   : > { %642 = vmatpush3.bf16.xpose.msra.mxu0 %v641_v36 }
 0x10e   : > { %644 = vmatprep.subr.bf16.mxu0 %v643_v37 }
 0x115   : > { %646 = vmatpush3.bf16.xpose.msra.mxu0 %v645_v42 }
 0x116   : > { %648 = vmatprep.subr.bf16.mxu0 %v647_v43 }
 0x11d   : > { %650 = vmatpush3.bf16.xpose.msra.mxu0 %v649_v48 }
 0x11e   : > { %652 = vmatprep.subr.bf16.mxu0 %v651_v49 }
 0x125   : > { %654 = vmatpush3.bf16.xpose.msra.mxu0 %v653_v54 }
 0x126   : > { %656 = vmatprep.subr.bf16.mxu0 %v655_v55 }
 0x12d   : > { %658 = vmatpush3.bf16.xpose.msra.mxu0 %v657_v58 }
 0x134   : > { %626 = vmatmul.mubr.f32.vlgmr.msra.gmra.mrb[0].mxu0 %v297_v23 }
 0x176   : > { %v426_v6 = vpop.permute.xlu0 %425 }
 0x177   : > { %vm427_vm0 = vcmp.eq.s32.totalorder %v420_v1, %v426_v6  ;;  %vm428_vm1 = vcmp.eq.s32.totalorder %v421_v7, %v426_v6 }
 0x207   : > { %v396_v3 = vpop.f32.mrb[0].mxu0 }
 0x208   : > { %v413_v4 = vmul.f32 %v406_v0, %v396_v3  ;;  %v398_v5 = vpop.f32.mrb[1].mxu0 }
 0x209   : > { %v414_v8 = vmul.f32 %v410_v2, %v398_v5 }
 0x20a   : > { %v422_v9 = vmul.f32 30.0, %v413_v4 }
 0x20b   : > { %v423_v10 = vmul.f32 30.0, %v414_v8 }
 0x20c   : > { %v584_v11 = vadd.f32 -12.0, %v422_v9 }
 0x20d   : > { %v585_v12 = vadd.f32 -12.0, %v423_v10 }
 0x20e   : > { %v431_v13 = vsel %vm427_vm0, %v584_v11, %v422_v9 }
 0x20f   : > { %v432_v14 = vsel %vm428_vm1, %v585_v12, %v423_v10  ;;  %433 = vst [vmem:[%s1128_s7] sm:$0xff] %v431_v13 }
 0x210   : > { %434 = vst [vmem:[%s1128_s7 + $0x8] sm:$0xff] %v432_v14 }
 0x211   : > { %810 = shalt.err (!%p807_p12)
}
 0x212   : > { %s811_s7 = scalar_lea.hbm %s1176_s10, 256  ;;  %s815_s21 = scalar_lea.hbm %s1246_s4, 1024 }
 0x213   : > { %p812_p5 = scmp.ne.s32.totalorder %s1176_s10, %s811_s7  ;;  %p816_p13 = scmp.lt.u32.totalorder %s1176_s10, %s1246_s4 }
 0x214   : > { %p817_p2 = scmp.lt.u32.totalorder %s815_s21, %s811_s7  ;;  %p819_p4 = scmp.lt.u32.totalorder %s811_s7, %s1176_s10 }
 0x215   : > { %p813_p7 = pnand %p812_p5, %p1267_p0 }
 0x216   : > { %p818_p8 = por %p817_p2, %p816_p13 }
 0x217   : > { %p814_p10 = pneg %p813_p7 }
 0x218   : > { %p820_p1 = por %p819_p4, %p818_p8 }
 0x21a   : > { %p821_p6 = pnand %p820_p1, %p814_p10 }
 0x21c   : > { %824 = shalt.err (!%p821_p6)
}
 0x21d   : > { %661 = dma.vmem_to_hbm [thread:$0]  (%p1267_p0), %s1178_s29, 256, %s1176_s10, %s436_s8  }
 0x21e PF: > { %p672_p9 = scmp.ge.s32.totalorder %s919_s25, 2  ;;  %s464_s9 = sand.u32 1, %s879_s15  }
 0x21f   : > { %p1268_p3 = scmp.ne.s32.totalorder %s1262_s14, 0  ;;  %s465_s1 = scalar_lea.sflag [#allocation5], %s464_s9 }
 0x221   : > { %p668_p11 = pnand %p672_p9, %p1268_p3 }
 0x223   : > { %874 = dma.done.wait (!%p668_p11), %s465_s1, 256  }
 0x224   : > { %876 = vsyncadd (!%p668_p11), %s465_s1, 4294967040  ;;  %s20_s25 = sadd.s32 1, %s919_s25   ;;  %s1269_s13 = sld [smem:[#allocation13_spill]] }
 0x225   : > { %p17_p12 = scmp.ge.s32.totalorder %s20_s25, 6   ;;  %s1270_s21 = sld [smem:[#allocation9_spill]] }
 0x226   : > { %s1271_s22 = sld [smem:[#allocation10_spill]]  ;;  %s1272_s23 = sld [smem:[#allocation11_spill]] }
 0x227   : > { %s1273_s24 = sld [smem:[#allocation12_spill]]  ;;  %s1274_s15 = smov %s883_s16 }
 0x228   : > { %s1275_s16 = smov %s887_s17  ;;  %s1276_s17 = smov %s1039_s12 }
 0x229   : > { %s1277_s18 = smov %s895_s19  ;;  %s1278_s19 = smov %s899_s20 }
 0x22a   : > { %s1279_s20 = smov %s1269_s13  ;;  %19 = sbr.rel (!%p17_p12) target bundleno = 11 (0xb), region = 94 }
 0x231   :  { %470 = vsyncpa [#allocation4], 1 }
 0x232   :  { %472 = vsyncpa [#allocation4 + $0x1], 1 }
 0x233   :  { %473 = vsyncpa [#allocation5], 1 }
 0x234   :  { %475 = vsyncpa [#allocation5 + $0x1], 1 }

</bundles_post_ra>
